<compile_context>
chip_gen: v6e
topology: v6e:2x2x1
jax: 0.10.0
libtpu: 0.0.40
codegen_flags: <defaults>
</compile_context>

<pallas_src>
import functools

import jax
import jax.numpy as jnp
from jax.experimental import pallas as pl
from jax.experimental.pallas import tpu as pltpu

_NEG_SLOPE = 0.2
_MXU_MIN_C = 8                      # channel count at which mixing moves to the MXU
_MAX_BLOCK_BYTES = 8 * 1024 * 1024  # in+out bytes per grid step (before 2x buffering)


def _leaky(v):
    return jnp.where(v > 0, v, v * _NEG_SLOPE)


# ---------------------------------------------------------------------------
# Kernels
# ---------------------------------------------------------------------------
def _vpu_kernel(x_ref, frame_ref, w1_ref, b1_ref, w2_ref, b2_ref, out_ref):
    """Small-C path (covers the spec's nchan=1): VPU scalar-MAC channel mix.

    x_ref    : (Nb, C, H,  W )  VMEM   un-padded input images
    frame_ref: (C,  Hf, Wf)     VMEM   precomputed border plane (grid-invariant)
    w*_ref   : (C, C) SMEM      b*_ref: (C,) SMEM
    out_ref  : (Nb, C, Hf, Wf)  VMEM
    """
    Nb, C, H, W = x_ref.shape

    # 1) Border rings come straight from the precomputed frame (no mask math).
    out_ref[...] = jnp.broadcast_to(frame_ref[...][None], out_ref.shape)

    # 2) Hoist every SMEM scalar read out of the unrolled MAC loops.
    w1 = [[w1_ref[o, i] for i in range(C)] for o in range(C)]
    w2 = [[w2_ref[o, i] for i in range(C)] for o in range(C)]
    b1 = [b1_ref[i] for i in range(C)]
    b2 = [b2_ref[i] for i in range(C)]

    x = x_ref[...]                                     # (Nb, C, H, W)

    # conv_1 (1x1) + leaky_relu, one (Nb, H, W) plane per intermediate channel.
    v4 = []
    for k in range(C):
        acc = x[:, 0] * w1[k][0]
        for ci in range(1, C):
            acc = acc + x[:, ci] * w1[k][ci]
        v4.append(_leaky(acc + b1[k]))

    # conv_2 (1x1); store each output channel's interior directly
    # (no concatenates, no intermediate relayouts).
    for co in range(C):
        acc = v4[0] * w2[co][0]
        for ci in range(1, C):
            acc = acc + v4[ci] * w2[co][ci]
        out_ref[:, co, 2:2 + H, 2:2 + W] = acc + b2[co]


def _mxu_kernel(x_ref, frame_ref, w1_ref, b1_ref, w2_ref, b2_ref, out_ref, *, H, W):
    """Large-C path: channel mixing as a batched MXU matmul (w @ x; the
    (C, P) result stays lane-dense).

    x_ref    : (Nb, C, H*W)     VMEM   (wrapper passes x lane-flattened; free)
    frame_ref: (C,  Hf, Wf)     VMEM
    w*_ref   : (C, C) VMEM      b*_ref: (C, 1) VMEM
    out_ref  : (Nb, C, Hf, Wf)  VMEM
    """
    Nb, C, _ = x_ref.shape

    out_ref[...] = jnp.broadcast_to(frame_ref[...][None], out_ref.shape)

    x = x_ref[...]                                            # (Nb, C, P0)
    w1 = jnp.broadcast_to(w1_ref[...][None], (Nb, C, C))
    w2 = jnp.broadcast_to(w2_ref[...][None], (Nb, C, C))
    dn = (((2,), (1,)), ((0,), (0,)))                         # bij,bjp->bip
    v1 = jax.lax.dot_general(w1, x, dn, preferred_element_type=jnp.float32)
    v4 = _leaky(v1 + b1_ref[...][None])
    v5 = jax.lax.dot_general(w2, v4, dn, preferred_element_type=jnp.float32)
    v5 = v5 + b2_ref[...][None]                               # (Nb, C, P0)

    # Place the interior row by row with static offsets; avoids an in-kernel
    # (Nb, C, P0) -> (Nb, C, H, W) vreg relayout.
    # TODO(synk): for very tall images switch this unrolled loop to a
    # fori_loop / 2-D row tiling.
    for r in range(H):
        out_ref[:, :, 2 + r, 2:2 + W] = v5[:, :, r * W:(r + 1) * W]


# ---------------------------------------------------------------------------
# Wrapper
# ---------------------------------------------------------------------------
def _pick_batch_block(N, per_image_bytes):
    """Largest divisor of N whose (in+out) block fits the VMEM budget while
    keeping >= 2 grid steps when N >= 2 (so both v7x TensorCores get work)."""
    best = 1
    for nb in range(1, N + 1):
        if N % nb != 0:
            continue
        if nb * per_image_bytes > _MAX_BLOCK_BYTES:
            continue
        if N >= 2 and (N // nb) < 2:
            continue
        best = nb
    return best


@jax.jit
def model_forward(x, w1, b1, w2, b2):
    """x: (N, C, H, W); w*: (C, C); b*: (C,). Returns (N, C, H+4, W+4) f32."""
    x = x.astype(jnp.float32)
    w1 = w1.astype(jnp.float32)
    b1 = b1.astype(jnp.float32)
    w2 = w2.astype(jnp.float32)
    b2 = b2.astype(jnp.float32)

    N, C, H, W = x.shape
    Hf, Wf = H + 4, W + 4

    # Precomputed border plane (all ring-mask math hoisted out of the kernel):
    # outermost ring -> b2; next ring -> w2 @ leaky_relu(b1) + b2.  The
    # interior values are overwritten by the kernel.
    ring = w2 @ _leaky(b1) + b2                                   # (C,)
    rr = jnp.arange(Hf, dtype=jnp.int32)[:, None]
    cc = jnp.arange(Wf, dtype=jnp.int32)[None, :]
    outer = (rr == 0) | (rr == Hf - 1) | (cc == 0) | (cc == Wf - 1)
    frame = jnp.where(outer[None], b2[:, None, None], ring[:, None, None])
    frame = frame.astype(jnp.float32)                             # (C, Hf, Wf)

    per_image_bytes = C * (H * W + Hf * Wf) * 4
    Nb = _pick_batch_block(N, per_image_bytes)
    grid = (N // Nb,)
    # TODO(synk): if a single image ever exceeds _MAX_BLOCK_BYTES (large
    # C*H*W, esp. on v7x's 64 MiB VMEM), add a second "parallel" grid axis
    # tiling output rows.

    use_mxu = C >= _MXU_MIN_C
    frame_spec = pl.BlockSpec((C, Hf, Wf), lambda g: (0, 0, 0))
    out_spec = pl.BlockSpec((Nb, C, Hf, Wf), lambda g: (g, 0, 0, 0))

    if use_mxu:
        kernel = functools.partial(_mxu_kernel, H=H, W=W)
        x_in = x.reshape(N, C, H * W)            # row-major reshape: free
        x_spec = pl.BlockSpec((Nb, C, H * W), lambda g: (g, 0, 0))
        w_spec = pl.BlockSpec((C, C), lambda g: (0, 0))
        b_spec = pl.BlockSpec((C, 1), lambda g: (0, 0))
        params = (w1, b1.reshape(C, 1), w2, b2.reshape(C, 1))
    else:
        kernel = _vpu_kernel
        x_in = x
        x_spec = pl.BlockSpec((Nb, C, H, W), lambda g: (g, 0, 0, 0))
        w_spec = pl.BlockSpec(memory_space=pltpu.MemorySpace.SMEM)
        b_spec = pl.BlockSpec(memory_space=pltpu.MemorySpace.SMEM)
        params = (w1, b1, w2, b2)

    # VMEM budget from the actual footprint (x2 for double buffering) + slack.
    in_bytes = Nb * C * H * W * 4
    out_bytes = Nb * C * Hf * Wf * 4
    const_bytes = C * Hf * Wf * 4 + 2 * (C * C + C) * 4
    vmem_limit = 2 * (in_bytes + out_bytes) + 2 * const_bytes + (4 << 20)
    vmem_limit = int(max(16 << 20, min(vmem_limit, 96 << 20)))

    out = pl.pallas_call(
        kernel,
        out_shape=jax.ShapeDtypeStruct((N, C, Hf, Wf), jnp.float32),
        grid_spec=pltpu.PrefetchScalarGridSpec(
            num_scalar_prefetch=0,
            grid=grid,
            in_specs=[x_spec, frame_spec, w_spec, b_spec, w_spec, b_spec],
            out_specs=out_spec,
        ),
        compiler_params=pltpu.CompilerParams(
            dimension_semantics=("parallel",),
            vmem_limit_bytes=vmem_limit,
        ),
    )(x_in, frame, *params)
    return out


# ---------------------------------------------------------------------------
# Reference + tests
# ---------------------------------------------------------------------------
def _reference(x, w1, b1, w2, b2):
    """Pure-JAX reference mirroring the PyTorch forward."""
    C = x.shape[1]
    dn = ("NCHW", "OIHW", "NCHW")
    hp = jax.lax.Precision.HIGHEST
    v1 = jax.lax.conv_general_dilated(
        x, w1.reshape(C, C, 1, 1), (1, 1), [(1, 1), (1, 1)],
        dimension_numbers=dn, precision=hp) + b1.reshape(1, C, 1, 1)
    v4 = jnp.where(v1 > 0, v1, v1 * _NEG_SLOPE)
    v5 = jax.lax.conv_general_dilated(
        v4, w2.reshape(C, C, 1, 1), (1, 1), [(1, 1), (1, 1)],
        dimension_numbers=dn, precision=hp) + b2.reshape(1, C, 1, 1)
    return v5


if __name__ == "__main__":
    def _run_case(key, N, C, H, W):
        kx, kw1, kb1, kw2, kb2 = jax.random.split(key, 5)
        x = jax.random.normal(kx, (N, C, H, W), dtype=jnp.float32)
        w1 = jax.random.normal(kw1, (C, C), dtype=jnp.float32) * 0.5
        b1 = jax.random.normal(kb1, (C,), dtype=jnp.float32) * 0.1
        w2 = jax.random.normal(kw2, (C, C), dtype=jnp.float32) * 0.5
        b2 = jax.random.normal(kb2, (C,), dtype=jnp.float32) * 0.1

        out = jax.block_until_ready(model_forward(x, w1, b1, w2, b2))
        ref = _reference(x, w1, b1, w2, b2)
        assert out.shape == (N, C, H + 4, W + 4), (out.shape, (N, C, H + 4, W + 4))
        assert jnp.allclose(out, ref, atol=1e-4, rtol=1e-4), (
            f"mismatch vs reference (C={C}): "
            f"max_err={jnp.max(jnp.abs(out - ref))}")

    key = jax.random.PRNGKey(0)
    k1, k2, k3 = jax.random.split(key, 3)
    # The spec's configuration (nchan=1) plus coverage for the multi-channel
    # VPU path and the MXU path, which were previously never validated.
    _run_case(k1, N=2, C=1, H=16, W=16)   # spec: nchan=1, VPU path, grid=(2,)
    _run_case(k2, N=2, C=3, H=5, W=7)     # small-C VPU path, odd spatial dims
    _run_case(k3, N=4, C=8, H=6, W=10)    # MXU path, Nb=2 images per step

    print("KERNEL_OK")
</pallas_src>

<mosaic_0001>
module attributes {stable_mosaic.version = 11 : i64} {
  func.func @_vpu_kernel(%arg0: i32, %arg1: memref<1x1x16x16xf32, #tpu.memory_space<vmem>>, %arg2: memref<1x20x20xf32, #tpu.memory_space<vmem>>, %arg3: memref<1x1xf32, #tpu.memory_space<smem>>, %arg4: memref<1xf32, #tpu.memory_space<smem>>, %arg5: memref<1x1xf32, #tpu.memory_space<smem>>, %arg6: memref<1xf32, #tpu.memory_space<smem>>, %arg7: memref<1x1x20x20xf32, #tpu.memory_space<vmem>>) attributes {dimension_semantics = [#tpu.dimension_semantics<parallel>], iteration_bounds = array<i64: 2>, scalar_prefetch = 0 : i64, scratch_operands = 0 : i64, tpu.core_type = #tpu.core_type<tc>, window_params = [{transform_indices = @transform_0, window_bounds = array<i64: 1, 1, 16, 16>}, {pipeline_mode = #tpu.pipeline_mode<synchronous>, transform_indices = @transform_1, window_bounds = array<i64: 1, 20, 20>}, {transform_indices = @transform_2, window_bounds = array<i64: 1, 1>}, {transform_indices = @transform_3, window_bounds = array<i64: 1>}, {transform_indices = @transform_4, window_bounds = array<i64: 1, 1>}, {transform_indices = @transform_5, window_bounds = array<i64: 1>}, {transform_indices = @transform_6, window_bounds = array<i64: 1, 1, 20, 20>}]} {
    %c0 = arith.constant 0 : index
    %c0_0 = arith.constant 0 : index
    %c0_1 = arith.constant 0 : index
    %0 = vector.load %arg2[%c0, %c0_0, %c0_1] : memref<1x20x20xf32, #tpu.memory_space<vmem>>, vector<1x20x20xf32>
    %1 = vector.shape_cast %0 : vector<1x20x20xf32> to vector<1x1x20x20xf32>
    %c0_2 = arith.constant 0 : index
    %c0_3 = arith.constant 0 : index
    %c0_4 = arith.constant 0 : index
    %c0_5 = arith.constant 0 : index
    %2 = vector.load %arg7[%c0_2, %c0_3, %c0_4, %c0_5] : memref<1x1x20x20xf32, #tpu.memory_space<vmem>>, vector<1x1x20x20xf32>
    tpu.vector_store %arg7[%c0_2, %c0_3, %c0_4, %c0_5], %1 {strides = array<i32>} : memref<1x1x20x20xf32, #tpu.memory_space<vmem>>, vector<1x1x20x20xf32>,
    %c0_6 = arith.constant 0 : index
    %c0_7 = arith.constant 0 : index
    %3 = memref.load %arg3[%c0_6, %c0_7] : memref<1x1xf32, #tpu.memory_space<smem>>
    %c0_8 = arith.constant 0 : index
    %c0_9 = arith.constant 0 : index
    %4 = memref.load %arg5[%c0_8, %c0_9] : memref<1x1xf32, #tpu.memory_space<smem>>
    %c0_10 = arith.constant 0 : index
    %5 = memref.load %arg4[%c0_10] : memref<1xf32, #tpu.memory_space<smem>>
    %c0_11 = arith.constant 0 : index
    %6 = memref.load %arg6[%c0_11] : memref<1xf32, #tpu.memory_space<smem>>
    %c0_12 = arith.constant 0 : index
    %c0_13 = arith.constant 0 : index
    %c0_14 = arith.constant 0 : index
    %c0_15 = arith.constant 0 : index
    %7 = vector.load %arg1[%c0_12, %c0_13, %c0_14, %c0_15] : memref<1x1x16x16xf32, #tpu.memory_space<vmem>>, vector<1x1x16x16xf32>
    %8 = vector.shape_cast %7 : vector<1x1x16x16xf32> to vector<1x16x16xf32>
    %9 = vector.broadcast %3 : f32 to vector<1x16x16xf32>
    %10 = arith.mulf %8, %9 : vector<1x16x16xf32>
    %11 = vector.broadcast %5 : f32 to vector<1x16x16xf32>
    %12 = arith.addf %10, %11 : vector<1x16x16xf32>
    %cst = arith.constant 0.000000e+00 : f32
    %13 = vector.broadcast %cst : f32 to vector<1x16x16xf32>
    %14 = arith.cmpf ogt, %12, %13 : vector<1x16x16xf32>
    %cst_16 = arith.constant 2.000000e-01 : f32
    %15 = vector.broadcast %cst_16 : f32 to vector<1x16x16xf32>
    %16 = arith.mulf %12, %15 : vector<1x16x16xf32>
    %17 = arith.select %14, %12, %16 : vector<1x16x16xi1>, vector<1x16x16xf32>
    %18 = vector.broadcast %4 : f32 to vector<1x16x16xf32>
    %19 = arith.mulf %17, %18 : vector<1x16x16xf32>
    %20 = vector.broadcast %6 : f32 to vector<1x16x16xf32>
    %21 = arith.addf %19, %20 : vector<1x16x16xf32>
    %c0_17 = arith.constant 0 : index
    %c0_18 = arith.constant 0 : index
    %c2 = arith.constant 2 : index
    %c2_19 = arith.constant 2 : index
    %22 = vector.load %arg7[%c0_17, %c0_18, %c2, %c2_19] : memref<1x1x20x20xf32, #tpu.memory_space<vmem>>, vector<1x1x16x16xf32>
    %23 = vector.shape_cast %22 : vector<1x1x16x16xf32> to vector<1x16x16xf32>
    %24 = vector.shape_cast %21 : vector<1x16x16xf32> to vector<1x1x16x16xf32>
    tpu.vector_store %arg7[%c0_17, %c0_18, %c2, %c2_19], %24 {strides = array<i32>} : memref<1x1x20x20xf32, #tpu.memory_space<vmem>>, vector<1x1x16x16xf32>,
    return
  }
  func.func @transform_0(%arg0: i32) -> (i32, i32, i32, i32) {
    %c0_i32 = arith.constant 0 : i32
    %c0_i32_0 = arith.constant 0 : i32
    %c0_i32_1 = arith.constant 0 : i32
    %c0_i32_2 = arith.constant 0 : i32
    return %arg0, %c0_i32, %c0_i32_0, %c0_i32_1 : i32, i32, i32, i32
  }
  func.func @transform_1(%arg0: i32) -> (i32, i32, i32) {
    %c0_i32 = arith.constant 0 : i32
    %c0_i32_0 = arith.constant 0 : i32
    %c0_i32_1 = arith.constant 0 : i32
    %c0_i32_2 = arith.constant 0 : i32
    return %c0_i32, %c0_i32_0, %c0_i32_1 : i32, i32, i32
  }
  func.func @transform_2(%arg0: i32) -> (i32, i32) {
    %c0_i32 = arith.constant 0 : i32
    %c0_i32_0 = arith.constant 0 : i32
    %c0_i32_1 = arith.constant 0 : i32
    return %c0_i32, %c0_i32_0 : i32, i32
  }
  func.func @transform_3(%arg0: i32) -> i32 {
    %c0_i32 = arith.constant 0 : i32
    %c0_i32_0 = arith.constant 0 : i32
    return %c0_i32 : i32
  }
  func.func @transform_4(%arg0: i32) -> (i32, i32) {
    %c0_i32 = arith.constant 0 : i32
    %c0_i32_0 = arith.constant 0 : i32
    %c0_i32_1 = arith.constant 0 : i32
    return %c0_i32, %c0_i32_0 : i32, i32
  }
  func.func @transform_5(%arg0: i32) -> i32 {
    %c0_i32 = arith.constant 0 : i32
    %c0_i32_0 = arith.constant 0 : i32
    return %c0_i32 : i32
  }
  func.func @transform_6(%arg0: i32) -> (i32, i32, i32, i32) {
    %c0_i32 = arith.constant 0 : i32
    %c0_i32_0 = arith.constant 0 : i32
    %c0_i32_1 = arith.constant 0 : i32
    %c0_i32_2 = arith.constant 0 : i32
    return %arg0, %c0_i32, %c0_i32_0, %c0_i32_1 : i32, i32, i32, i32
  }
}

</mosaic_0001>

<bundles_post_ra>
// kernel: model_forward.1
= control target key start
LH: loop header
LB: loop body
LE: loop exit
PB: predicated region body
PF: predicated region fallthrough
CT: control target
= control target key end

     0   :  { %s431_s29 = smov 0   ;;  %s463_s0 = inlined_call_operand.vmem [shape: f32[2,1,16,16], index: 0, kind: input, shape index: {}]   ;;  %s464_s1 = inlined_call_operand.vmem [shape: f32[1,20,20], index: 1, kind: input, shape index: {}]   ;;  %s465_s2 = inlined_call_operand.<no memory space> [shape: f32[1,1], index: 2, kind: input, shape index: {}]   ;;  %s466_s3 = inlined_call_operand.<no memory space> [shape: f32[1], index: 3, kind: input, shape index: {}]   ;;  %s467_s4 = inlined_call_operand.<no memory space> [shape: f32[1,1], index: 4, kind: input, shape index: {}]   ;;  %s468_s6 = inlined_call_operand.vmem [shape: f32[2,1,20,20], index: 6, kind: output, shape index: {}]   ;;  %s469_s5 = inlined_call_operand.<no memory space> [shape: f32[1], index: 5, kind: input, shape index: {}]  }
   0x1   :  { %11 = sst [smem:[#allocation2]] %s465_s2 }
   0x2   :  { %12 = sst [smem:[#allocation3]] %s466_s3 }
   0x3   :  { %13 = sst [smem:[#allocation4]] %s467_s4 }
   0x4   :  { %14 = sst [smem:[#allocation5]] %s469_s5 }
   0x5 LB: > { %s354_s2 = sadd.s32 4294967295, %s381_s29   ;;  %p358_p0 = scmp.ge.s32.totalorder %s381_s29, 1  ;;  %s381_s29 = sphi %s431_s29, %s20_s29  }
   0x6   : > { %p216_p1 = scmp.lt.s32.totalorder %s381_s29, 3 }
   0x8   : > { %p217_p2 = pnand %p358_p0, %p216_p1 }
   0x9   : > { %p246_p3 = scmp.lt.s32.totalorder (!%p217_p2), %s354_s2, 1  ;;  %s264_s3 = sld [smem:[#allocation2]] (!%p217_p2) }
   0xa   : > { %220 = sbr.rel (%p217_p2) target bundleno = 150 (0x96), region = 44  ;;  %s439_s4 = sld [smem:[#allocation4]] (!%p217_p2) }
   0xb   : > { %s266_s5 = sld [smem:[#allocation3]] (!%p217_p2)  ;;  %s383_s21 = smov (!%p217_p2), 2  }
   0xc   : > { %s441_s7 = sld [smem:[#allocation5]] (!%p217_p2) }
   0xf   : > { %s471_s2 = smov (!%p246_p3, %s354_s2), 1  ;;  %v256_v0 = vld [vmem:[%s464_s1] sm:$0xff]  ;;  %v257_v1 = vld [vmem:[%s464_s1 + $0x8] sm:$0xff]  ;;  %vm259_vm0 = vcmask 162816   ;;  %v270_v4 = vstv %s264_s3  ;;  %v258_v5 = vld [vmem:[%s464_s1 + $0x10] sm:$0xf] }
  0x10   : > { %s364_s30 = sshll.u32 %s471_s2, 4  ;;  %s365_s11 = smul.u32 24, %s471_s2  ;;  %vm262_vm1 = vcmask 158720   ;;  %v282_v11 = vstv %s439_s4  ;;  %vm296_vm4 = vcmask 146448  }
  0x11   : > { %s250_s10 = scalar_lea.vmem %s463_s0, %s364_s30  ;;  %v273_v8 = vstv %s266_s5 }
  0x12   : > { %v268_v2 = vld [vmem:[%s250_s10] sm:$0xff]  ;;  %v269_v3 = vld [vmem:[%s250_s10 + $0x8] sm:$0xff]  ;;  %s255_s20 = scalar_lea.vmem %s468_s6, %s365_s11  ;;  %v285_v16 = vstv %s441_s7 }
  0x13   : > { %v271_v6 = vmul.f32 %v270_v4, %v268_v2  ;;  %v272_v7 = vmul.f32 %v270_v4, %v269_v3  ;;  %260 = vst.msk [vmem:[%s255_s20] sm:$0xff] %vm259_vm0, %v256_v0  ;;  %261 = vst.msk [vmem:[%s255_s20 + $0x8] sm:$0xff] %vm259_vm0, %v257_v1 }
  0x14   : > { %263 = vst.msk [vmem:[%s255_s20 + $0x10] sm:$0xf] %vm262_vm1, %v258_v5 }
  0x15   : > { %v274_v9 = vadd.f32 %v273_v8, %v271_v6  ;;  %v275_v10 = vadd.f32 %v273_v8, %v272_v7 }
  0x17   : > { %vm276_vm2 = vcmp.gt.f32.partialorder %v274_v9, 0.0  ;;  %vm277_vm3 = vcmp.gt.f32.partialorder %v275_v10, 0.0  ;;  %v278_v12 = vmul.f32 0.2, %v274_v9  ;;  %v279_v13 = vmul.f32 0.2, %v275_v10 }
  0x19   : > { %v280_v14 = vsel %vm276_vm2, %v274_v9, %v278_v12  ;;  %v281_v15 = vsel %vm277_vm3, %v275_v10, %v279_v13 }
  0x1a   : > { %v283_v17 = vmul.f32 %v282_v11, %v280_v14  ;;  %v284_v18 = vmul.f32 %v282_v11, %v281_v15 }
  0x1c   : > { %v286_v19 = vadd.f32 %v285_v16, %v283_v17  ;;  %v287_v20 = vadd.f32 %v285_v16, %v284_v18 }
  0x1e   : > { %290 = vrot.lane.b32.xlu0 %v286_v19, %s383_s21 }
  0x22   : > { %292 = vrot.lane.b32.xlu0 %v287_v20, %s383_s21 }
  0x90   : > { %v291_v21 = vpop.permute.xlu0 %290 }
  0x91   : > { %297 = vst.msk [vmem:[%s255_s20 + $0x2] sm:$0xff] %vm296_vm4, %v291_v21 }
  0x94   : > { %v293_v22 = vpop.permute.xlu0 %292 }
  0x95   : > { %298 = vst.msk [vmem:[%s255_s20 + $0xa] sm:$0xff] %vm296_vm4, %v293_v22 }
  0x96 PF: > { %s20_s29 = sadd.s32 1, %s381_s29  }
  0x97   : > { %p17_p4 = scmp.ge.s32.totalorder %s20_s29, 4  }
  0x99   :  { %19 = sbr.rel (!%p17_p4) target bundleno = 5 (0x5), region = 74 }

</bundles_post_ra>
